<compile_context>
chip_gen: v7x
topology: tpu7x:2x2x1
jax: 0.10.0
libtpu: 0.0.40
codegen_flags: <defaults>
</compile_context>

<pallas_src>
import jax
import jax.numpy as jnp
from jax.experimental import pallas as pl
from jax.experimental.pallas import tpu as pltpu

KH = KW = 3  # BlockConvNormActivation default kernel size


# ----------------------------------------------------------------------------
# VMEM budget / tile-size selection (per TPU generation)
# ----------------------------------------------------------------------------
def _vmem_budget_bytes():
    """Per-grid-step VMEM budget (double-buffered blocks + scratch)."""
    try:
        cap = int(pltpu.get_tpu_info().vmem_capacity_bytes)
    except Exception:
        cap = 64 * 1024 * 1024                      # conservative (v7x-like)
    if cap >= 100 * 1024 * 1024:                    # v5e / v6e: 128 MiB physical
        return 96 * 1024 * 1024
    return max(16 * 1024 * 1024, int(cap * 0.70))   # v7x: 64 MiB -> ~44 MiB


def _block_h_candidates(h):
    cands = [d for d in range(8, h + 1, 8) if h % d == 0]
    if h not in cands:
        cands.append(h)            # single full-height tile as last resort
    return sorted(set(cands))


def _pick_block_h(n, h, budget, footprint_fn):
    cands = _block_h_candidates(h)
    fits = [d for d in cands if footprint_fn(d) <= budget]
    if not fits:
        fits = [min(cands)]        # smallest divisor tile; best effort
    # biggest tile that fits the budget, but keep >= ~8 grid steps when
    # possible so the double-buffered pipeline can hide DMA behind compute.
    return max(fits, key=lambda d: (min(n * (h // d), 8), d))


# ----------------------------------------------------------------------------
# Lane-dense banded-weight path (small channel counts)
# ----------------------------------------------------------------------------
def _vertical_upsample_matrix(th, thc):
    """4-tap (0.25/0.75) 2x vertical bilinear upsample of a (THc+2)-row coarse
    buffer (row 0 / THc+1 are the clamped halo rows) into TH+2 fine rows."""
    r = jnp.arange(th + 2)
    m = r // 2
    frac = jnp.where(r % 2 == 0, 0.25, 0.75).astype(jnp.float32)
    cols = jnp.arange(thc + 2)[None, :]
    a = ((cols == m[:, None]) * (1.0 - frac)[:, None]
         + (cols == (m + 1)[:, None]) * frac[:, None])
    return a.astype(jnp.float32)                      # (TH+2, THc+2)


def _band_weights(w_hwio, cl, w_sp, wc, dtype=jnp.bfloat16):
    """Fold the 3x3 conv's kw taps (and, for the latent, the 2x horizontal
    bilinear upsample) into lane-dense banded weight matrices."""
    cout = w_hwio.shape[-1]
    w_l = w_hwio[:, :, :cl, :]        # latent channels come first in the concat
    w_x = w_hwio[:, :, cl:, :]
    cx = w_x.shape[2]

    shift = [jnp.eye(w_sp, dtype=jnp.float32, k=1 - kw) for kw in range(KW)]

    bx = []
    for kh in range(KH):
        m = jnp.zeros((w_sp * cx, w_sp * cout), jnp.float32)
        for kw in range(KW):
            m = m + jnp.kron(shift[kw], w_x[kh, kw])
        bx.append(m)
    band_x = jnp.stack(bx, axis=0).astype(dtype)      # (3, W*Cx, W*Cout)

    band_l = None
    if cl > 0:
        # 2x horizontal bilinear (half-pixel centers, edge clamped) matrix
        q = jnp.arange(w_sp)
        cc = (q + 0.5) / 2.0 - 0.5
        j0 = jnp.floor(cc).astype(jnp.int32)
        frac = (cc - j0).astype(jnp.float32)
        j0c = jnp.clip(j0, 0, wc - 1)
        j1c = jnp.clip(j0 + 1, 0, wc - 1)
        rows = jnp.arange(wc)[:, None]
        hmat = ((rows == j0c[None, :]) * (1.0 - frac)[None, :]
                + (rows == j1c[None, :]) * frac[None, :])      # (Wc, W)
        bl = []
        for kh in range(KH):
            m = jnp.zeros((wc * cl, w_sp * cout), jnp.float32)
            for kw in range(KW):
                m = m + jnp.kron(hmat @ shift[kw], w_l[kh, kw])
            bl.append(m)
        band_l = jnp.stack(bl, axis=0).astype(dtype)   # (3, Wc*Cl, W*Cout)
    return band_x, band_l


def _make_band_kernel(with_latent, th, thc, hc, w_lanes_out):
    """Lane-dense fused kernel: 3 (6 with latent) banded MXU matmuls per tile,
    f32 BatchNorm/bias epilogue, ReLU, lane-dense (TH, W*Cout) store."""

    def kernel(*refs):
        if with_latent:
            lat_ref, xm, xt, xb, a_ref, wx_ref, wl_ref, sc_ref, sh_ref, o_ref = refs
        else:
            xm, xt, xb, wx_ref, sc_ref, sh_ref, o_ref = refs

        hi = pl.program_id(1)
        nh = pl.num_programs(1)

        # --- x with a 1-row halo on each side (zero = conv padding at borders)
        top = xt[0, 7:8, :]
        bot = xb[0, 0:1, :]
        top = jnp.where(hi > 0, top, jnp.zeros_like(top))
        bot = jnp.where(hi < nh - 1, bot, jnp.zeros_like(bot))
        xbuf = jnp.concatenate([top, xm[0], bot], axis=0)       # (TH+2, W*Cx)
        xb16 = xbuf.astype(jnp.bfloat16)

        acc = jnp.zeros((th, w_lanes_out), jnp.float32)
        for kh in range(KH):
            acc += jnp.dot(xb16[kh:kh + th], wx_ref[kh],
                           preferred_element_type=jnp.float32)

        if with_latent:
            # coarse latent rows [hi*THc-1, hi*THc+THc], edge clamped
            start = hi * thc
            ctop = lat_ref[0, pl.ds(jnp.maximum(start - 1, 0), 1), :]
            cmid = lat_ref[0, pl.ds(start, thc), :]
            cbot = lat_ref[0, pl.ds(jnp.minimum(start + thc, hc - 1), 1), :]
            latc = jnp.concatenate([ctop, cmid, cbot], axis=0)  # (THc+2, Wc*Cl)
            # fused 2x vertical bilinear upsample (one small matmul)
            latv = jnp.dot(a_ref[...], latc.astype(jnp.float32),
                           preferred_element_type=jnp.float32)  # (TH+2, Wc*Cl)
            # conv zero-padding rows of the (upsampled) latent at image borders
            row = jax.lax.broadcasted_iota(jnp.int32, (th + 2, 1), 0)
            drop = ((row == 0) & (hi == 0)) | ((row == th + 1) & (hi == nh - 1))
            latv = jnp.where(drop, 0.0, latv)
            lv16 = latv.astype(jnp.bfloat16)
            for kh in range(KH):
                acc += jnp.dot(lv16[kh:kh + th], wl_ref[kh],
                               preferred_element_type=jnp.float32)

        # BatchNorm (eval) + conv bias as an exact f32 epilogue, then ReLU.
        y = jnp.maximum(acc * sc_ref[...] + sh_ref[...], 0.0)
        o_ref[...] = y.reshape(1, th, w_lanes_out).astype(o_ref.dtype)

    return kernel


def _forward_band(params, x_nhwc, latent_nhwc, budget):
    n, h, w_sp, cx = x_nhwc.shape
    cout = params["b"].shape[0]
    with_latent = latent_nhwc is not None
    cl = latent_nhwc.shape[-1] if with_latent else 0
    hc = h // 2 if with_latent else 0
    wc = w_sp // 2 if with_latent else 0

    scale = params["bn_scale"].astype(jnp.float32)
    shift = (params["b"] * params["bn_scale"] + params["bn_shift"]).astype(jnp.float32)
    wco = w_sp * cout
    scale_t = jnp.tile(scale, w_sp).reshape(1, wco)
    shift_t = jnp.tile(shift, w_sp).reshape(1, wco)

    band_x, band_l = _band_weights(params["w"], cl, w_sp, wc)
    band_bytes = band_x.size * 2 + (band_l.size * 2 if band_l is not None else 0)

    wcx = w_sp * cx
    wcl = wc * cl
    out_itemsize = x_nhwc.dtype.itemsize

    def footprint(th):
        x_in = (th + 16) * wcx * 4                   # main tile + 2x 8-row halos
        lat_in = hc * wcl * 4 if with_latent else 0  # full-height coarse latent
        out = th * wco * out_itemsize
        interm = (th + 2) * (wcx + wcl) * 6 + th * wco * 4 + (th + 2) * wcl * 4
        return 2 * (x_in + lat_in + out) + band_bytes + interm + (1 << 20)

    th = _pick_block_h(n, h, budget, footprint)
    thc = th // 2
    thb = th // 8
    n_h = h // th

    x_flat = x_nhwc.reshape(n, h, wcx)               # free reshape (row-major)
    main_spec = pl.BlockSpec((1, th, wcx), lambda ni, hi: (ni, hi, 0))
    top_spec = pl.BlockSpec(
        (1, 8, wcx), lambda ni, hi: (ni, jnp.maximum(hi * thb - 1, 0), 0))
    bot_spec = pl.BlockSpec(
        (1, 8, wcx), lambda ni, hi: (ni, jnp.minimum(hi * thb + thb, h // 8 - 1), 0))

    in_specs, operands = [], []
    if with_latent:
        lat_flat = latent_nhwc.reshape(n, hc, wcl)
        in_specs.append(pl.BlockSpec((1, hc, wcl), lambda ni, hi: (ni, 0, 0)))
        operands.append(lat_flat)
    in_specs += [main_spec, top_spec, bot_spec]
    operands += [x_flat, x_flat, x_flat]
    if with_latent:
        a_mat = _vertical_upsample_matrix(th, thc)
        in_specs.append(pl.BlockSpec((th + 2, thc + 2), lambda ni, hi: (0, 0)))
        operands.append(a_mat)
    in_specs.append(pl.BlockSpec((KH, wcx, wco), lambda ni, hi: (0, 0, 0)))
    operands.append(band_x)
    if with_latent:
        in_specs.append(pl.BlockSpec((KH, wcl, wco), lambda ni, hi: (0, 0, 0)))
        operands.append(band_l)
    in_specs += [pl.BlockSpec((1, wco), lambda ni, hi: (0, 0))] * 2
    operands += [scale_t, shift_t]

    y = pl.pallas_call(
        _make_band_kernel(with_latent, th, thc, hc, wco),
        out_shape=jax.ShapeDtypeStruct((n, h, wco), x_nhwc.dtype),
        grid_spec=pltpu.PrefetchScalarGridSpec(
            num_scalar_prefetch=0,
            grid=(n, n_h),
            in_specs=in_specs,
            out_specs=pl.BlockSpec((1, th, wco), lambda ni, hi: (ni, hi, 0)),
        ),
        compiler_params=pltpu.CompilerParams(
            dimension_semantics=("parallel", "parallel"),
            vmem_limit_bytes=int(budget),
        ),
    )(*operands)
    return y.reshape(n, h, w_sp, cout)


# ----------------------------------------------------------------------------
# Per-tap accumulation path (large channel counts)
# ----------------------------------------------------------------------------
def _make_general_kernel(with_latent, th, w_sp, cl, cx, cout, flatten):
    """No materialized im2col patch: each (kh, kw) tap is one K=C matmul
    accumulated in f32; channel-split weights avoid any in-VMEM concat."""

    def kernel(*refs):
        if with_latent:
            lm, lt, lb, xm, xt, xb, wl_ref, wx_ref, sc_ref, sh_ref, o_ref = refs
        else:
            xm, xt, xb, wx_ref, sc_ref, sh_ref, o_ref = refs

        hi = pl.program_id(1)
        nh = pl.num_programs(1)

        def padded(m, t, b, c):
            top = jnp.where(hi > 0, t[0], jnp.zeros_like(t[0]))          # (1,W,C)
            bot = jnp.where(hi < nh - 1, b[0], jnp.zeros_like(b[0]))
            buf = jnp.concatenate([top, m[0], bot], axis=0)              # (TH+2,W,C)
            z = jnp.zeros((th + 2, 1, c), buf.dtype)
            return jnp.concatenate([z, buf, z], axis=1).astype(jnp.bfloat16)

        acc = jnp.zeros((th * w_sp, cout), jnp.float32)
        xp = padded(xm, xt, xb, cx)
        for kh in range(KH):
            for kw in range(KW):
                patch = xp[kh:kh + th, kw:kw + w_sp, :].reshape(th * w_sp, cx)
                acc = acc + jnp.dot(patch, wx_ref[kh, kw],
                                    preferred_element_type=jnp.float32)
        if with_latent:
            lp = padded(lm, lt, lb, cl)
            for kh in range(KH):
                for kw in range(KW):
                    patch = lp[kh:kh + th, kw:kw + w_sp, :].reshape(th * w_sp, cl)
                    acc = acc + jnp.dot(patch, wl_ref[kh, kw],
                                        preferred_element_type=jnp.float32)

        y = jnp.maximum(acc * sc_ref[...] + sh_ref[...], 0.0)
        if flatten:
            o_ref[...] = y.reshape(1, th, w_sp * cout).astype(o_ref.dtype)
        else:
            o_ref[...] = y.reshape(1, th, w_sp, cout).astype(o_ref.dtype)

    return kernel


def _forward_general(params, x_nhwc, latent_nhwc, budget):
    n, h, w_sp, cx = x_nhwc.shape
    cout = params["b"].shape[0]
    with_latent = latent_nhwc is not None
    cl = latent_nhwc.shape[-1] if with_latent else 0
    cin = cl + cx

    if with_latent and latent_nhwc.shape[1:3] != (h, w_sp):
        # TODO(synk): fuse the general-ratio bilinear resize into the kernel
        # (done for the exact-2x case on the lane-dense path); here the
        # full-resolution latent still makes one extra HBM round trip.
        latent_nhwc = jax.image.resize(
            latent_nhwc, (n, h, w_sp, cl), method="linear")

    w_l = params["w"][:, :, :cl, :].astype(jnp.bfloat16)
    w_x = params["w"][:, :, cl:, :].astype(jnp.bfloat16)
    scale = params["bn_scale"].reshape(1, cout).astype(jnp.float32)
    shift = (params["b"] * params["bn_scale"]
             + params["bn_shift"]).reshape(1, cout).astype(jnp.float32)

    out_itemsize = x_nhwc.dtype.itemsize
    flatten = cout < 128      # only flatten lanes when Cout is lane-sparse

    def footprint(th):
        x_in = (th + 2) * w_sp * cx * 4
        lat_in = (th + 2) * w_sp * cl * 4 if with_latent else 0
        out = th * w_sp * cout * out_itemsize
        weights = 9 * cin * cout * 2
        interm = ((th + 2) * (w_sp + 2) * cin * 6
                  + th * w_sp * cout * 4 + th * w_sp * max(cx, 1) * 2)
        return 2 * (x_in + lat_in + out) + weights + interm + (1 << 20)

    th = _pick_block_h(n, h, budget, footprint)
    n_h = h // th

    def main_spec(c):
        return pl.BlockSpec((1, th, w_sp, c), lambda ni, hi: (ni, hi, 0, 0))

    def top_spec(c):
        return pl.BlockSpec((1, 1, w_sp, c),
                            lambda ni, hi: (ni, jnp.maximum(hi * th - 1, 0), 0, 0))

    def bot_spec(c):
        return pl.BlockSpec((1, 1, w_sp, c),
                            lambda ni, hi: (ni, jnp.minimum(hi * th + th, h - 1), 0, 0))

    in_specs, operands = [], []
    if with_latent:
        in_specs += [main_spec(cl), top_spec(cl), bot_spec(cl)]
        operands += [latent_nhwc, latent_nhwc, latent_nhwc]
    in_specs += [main_spec(cx), top_spec(cx), bot_spec(cx)]
    operands += [x_nhwc, x_nhwc, x_nhwc]
    if with_latent:
        in_specs.append(pl.BlockSpec((KH, KW, cl, cout), lambda ni, hi: (0, 0, 0, 0)))
        operands.append(w_l)
    in_specs.append(pl.BlockSpec((KH, KW, cx, cout), lambda ni, hi: (0, 0, 0, 0)))
    operands.append(w_x)
    in_specs += [pl.BlockSpec((1, cout), lambda ni, hi: (0, 0))] * 2
    operands += [scale, shift]

    if flatten:
        out_shape = jax.ShapeDtypeStruct((n, h, w_sp * cout), x_nhwc.dtype)
        out_spec = pl.BlockSpec((1, th, w_sp * cout), lambda ni, hi: (ni, hi, 0))
    else:
        out_shape = jax.ShapeDtypeStruct((n, h, w_sp, cout), x_nhwc.dtype)
        out_spec = pl.BlockSpec((1, th, w_sp, cout), lambda ni, hi: (ni, hi, 0, 0))

    y = pl.pallas_call(
        _make_general_kernel(with_latent, th, w_sp, cl, cx, cout, flatten),
        out_shape=out_shape,
        grid_spec=pltpu.PrefetchScalarGridSpec(
            num_scalar_prefetch=0,
            grid=(n, n_h),
            in_specs=in_specs,
            out_specs=out_spec,
        ),
        compiler_params=pltpu.CompilerParams(
            dimension_semantics=("parallel", "parallel"),
            vmem_limit_bytes=int(budget),
        ),
    )(*operands)
    if flatten:
        y = y.reshape(n, h, w_sp, cout)
    return y


# ----------------------------------------------------------------------------
# Public forward passes
# ----------------------------------------------------------------------------
def latent_conv_forward_nhwc(params, x_nhwc, latent_nhwc=None):
    """LatentConv forward (eval mode) in NHWC (preferred: keep the UNet NHWC)."""
    n, h, w_sp, cx = x_nhwc.shape
    cout = params["b"].shape[0]
    budget = _vmem_budget_bytes()

    if latent_nhwc is not None and latent_nhwc.shape[1:3] == (h, w_sp):
        # Latent already at x's resolution: it is just extra leading channels.
        x_nhwc = jnp.concatenate([latent_nhwc, x_nhwc], axis=-1)
        latent_nhwc = None
        cx = x_nhwc.shape[-1]

    cl = 0 if latent_nhwc is None else latent_nhwc.shape[-1]
    cin = cl + cx

    band_bytes = KH * (w_sp * cx) * (w_sp * cout) * 2
    if cl:
        band_bytes += KH * ((w_sp // 2) * cl) * (w_sp * cout) * 2
    ratio2 = (latent_nhwc is None
              or (latent_nhwc.shape[1] * 2 == h and latent_nhwc.shape[2] * 2 == w_sp))
    use_band = (9 * cin <= 256 and cout <= 128 and h % 8 == 0
                and ratio2 and band_bytes <= 4 * 1024 * 1024)

    if use_band:
        return _forward_band(params, x_nhwc, latent_nhwc, budget)
    return _forward_general(params, x_nhwc, latent_nhwc, budget)


def latent_conv_forward(params, x_nchw, latent_nchw=None):
    """NCHW in/out, matching the PyTorch module (layout converted at the edge)."""
    x_nhwc = jnp.transpose(x_nchw, (0, 2, 3, 1))
    lat = None if latent_nchw is None else jnp.transpose(latent_nchw, (0, 2, 3, 1))
    y = latent_conv_forward_nhwc(params, x_nhwc, lat)
    return jnp.transpose(y, (0, 3, 1, 2))


# ----------------------------------------------------------------------------
# Reference (f32, XLA) and parameter init
# ----------------------------------------------------------------------------
def reference_forward(params, x_nchw, latent_nchw=None):
    x = jnp.transpose(x_nchw, (0, 2, 3, 1))
    if latent_nchw is not None:
        lat = jnp.transpose(latent_nchw, (0, 2, 3, 1))
        if lat.shape[1:3] != x.shape[1:3]:
            lat = jax.image.resize(
                lat, (x.shape[0],) + x.shape[1:3] + (lat.shape[-1],),
                method="linear")
        x = jnp.concatenate([lat, x], axis=-1)
    y = jax.lax.conv_general_dilated(
        x, params["w"], window_strides=(1, 1), padding="SAME",
        dimension_numbers=("NHWC", "HWIO", "NHWC"),
        precision=jax.lax.Precision.HIGHEST)
    y = (y + params["b"]) * params["bn_scale"] + params["bn_shift"]
    y = jnp.maximum(y, 0.0)
    return jnp.transpose(y, (0, 3, 1, 2))


def init_params(key, in_channels, latent_channels, out_channels, eps=1e-5):
    cin = in_channels + (latent_channels or 0)
    kw_, kb_, kg, kbe, km, kv = jax.random.split(key, 6)
    fan_in = cin * KH * KW
    bound = 1.0 / jnp.sqrt(fan_in)
    w = jax.random.uniform(kw_, (KH, KW, cin, out_channels), jnp.float32, -bound, bound)
    b = jax.random.uniform(kb_, (out_channels,), jnp.float32, -bound, bound)
    # BatchNorm2d in eval mode (running statistics).
    # TODO(synk): training-mode BatchNorm (batch statistics + stat updates) is
    # not implemented in-kernel.
    gamma = 1.0 + 0.2 * jax.random.normal(kg, (out_channels,), jnp.float32)
    beta = 0.1 * jax.random.normal(kbe, (out_channels,), jnp.float32)
    mean = 0.1 * jax.random.normal(km, (out_channels,), jnp.float32)
    var = jax.random.uniform(kv, (out_channels,), jnp.float32, 0.5, 1.5)
    scale = gamma / jnp.sqrt(var + eps)
    shift = beta - mean * scale
    return {"w": w, "b": b, "bn_scale": scale, "bn_shift": shift}


if __name__ == "__main__":
    key = jax.random.PRNGKey(0)
    k_x, k_lat, k_p, k_p2, k_x3, k_lat3, k_p3 = jax.random.split(key, 7)

    fwd = jax.jit(latent_conv_forward)

    # 1. small-channel latent path: fused 2x upsample + conv + BN + ReLU (band)
    x = jax.random.normal(k_x, (2, 4, 16, 16), jnp.float32)          # NCHW
    latent = jax.random.normal(k_lat, (2, 2, 8, 8), jnp.float32)     # NCHW
    params = init_params(k_p, 4, 2, 8)
    out = jax.block_until_ready(fwd(params, x, latent))
    ref = reference_forward(params, x, latent)
    assert out.shape == (2, 8, 16, 16), out.shape
    err = float(jnp.max(jnp.abs(out - ref)))
    assert err < 3e-2, f"latent (band) path max abs err {err}"

    # 2. no-latent path (band)
    params2 = init_params(k_p2, 4, None, 8)
    out2 = jax.block_until_ready(fwd(params2, x, None))
    ref2 = reference_forward(params2, x, None)
    err2 = float(jnp.max(jnp.abs(out2 - ref2)))
    assert out2.shape == (2, 8, 16, 16) and err2 < 3e-2, (out2.shape, err2)

    # 3. large-channel path (per-tap accumulation, no im2col patch)
    x3 = jax.random.normal(k_x3, (1, 72, 16, 16), jnp.float32)
    latent3 = jax.random.normal(k_lat3, (1, 8, 8, 8), jnp.float32)
    params3 = init_params(k_p3, 72, 8, 128)
    out3 = jax.block_until_ready(fwd(params3, x3, latent3))
    ref3 = reference_forward(params3, x3, latent3)
    err3 = float(jnp.max(jnp.abs(out3 - ref3)))
    assert out3.shape == (1, 128, 16, 16) and err3 < 4e-2, (out3.shape, err3)

    print("KERNEL_OK")
</pallas_src>

<mosaic_0001>
module attributes {stable_mosaic.version = 11 : i64} {
  func.func @kernel(%arg0: i32, %arg1: i32, %arg2: memref<1x8x16xf32, #tpu.memory_space<vmem>>, %arg3: memref<1x8x64xf32, #tpu.memory_space<vmem>>, %arg4: memref<1x8x64xf32, #tpu.memory_space<vmem>>, %arg5: memref<1x8x64xf32, #tpu.memory_space<vmem>>, %arg6: memref<10x6xf32, #tpu.memory_space<vmem>>, %arg7: memref<3x64x128xbf16, #tpu.memory_space<vmem>>, %arg8: memref<3x16x128xbf16, #tpu.memory_space<vmem>>, %arg9: memref<1x128xf32, #tpu.memory_space<vmem>>, %arg10: memref<1x128xf32, #tpu.memory_space<vmem>>, %arg11: memref<1x8x128xf32, #tpu.memory_space<vmem>>) attributes {dimension_semantics = [#tpu.dimension_semantics<parallel>, #tpu.dimension_semantics<parallel>], iteration_bounds = array<i64: 2, 2>, scalar_prefetch = 0 : i64, scratch_operands = 0 : i64, tpu.core_type = #tpu.core_type<tc>, window_params = [{transform_indices = @transform_0, window_bounds = array<i64: 1, 8, 16>}, {transform_indices = @transform_1, window_bounds = array<i64: 1, 8, 64>}, {transform_indices = @transform_2, window_bounds = array<i64: 1, 8, 64>}, {transform_indices = @transform_3, window_bounds = array<i64: 1, 8, 64>}, {pipeline_mode = #tpu.pipeline_mode<synchronous>, transform_indices = @transform_4, window_bounds = array<i64: 10, 6>}, {pipeline_mode = #tpu.pipeline_mode<synchronous>, transform_indices = @transform_5, window_bounds = array<i64: 3, 64, 128>}, {pipeline_mode = #tpu.pipeline_mode<synchronous>, transform_indices = @transform_6, window_bounds = array<i64: 3, 16, 128>}, {pipeline_mode = #tpu.pipeline_mode<synchronous>, transform_indices = @transform_7, window_bounds = array<i64: 1, 128>}, {pipeline_mode = #tpu.pipeline_mode<synchronous>, transform_indices = @transform_8, window_bounds = array<i64: 1, 128>}, {transform_indices = @transform_9, window_bounds = array<i64: 1, 8, 128>}]} {
    %c0 = arith.constant 0 : index
    %c7 = arith.constant 7 : index
    %c0_0 = arith.constant 0 : index
    %0 = vector.load %arg4[%c0, %c7, %c0_0] : memref<1x8x64xf32, #tpu.memory_space<vmem>>, vector<1x1x64xf32>
    %1 = vector.shape_cast %0 : vector<1x1x64xf32> to vector<1x64xf32>
    %c0_1 = arith.constant 0 : index
    %c0_2 = arith.constant 0 : index
    %c0_3 = arith.constant 0 : index
    %2 = vector.load %arg5[%c0_1, %c0_2, %c0_3] : memref<1x8x64xf32, #tpu.memory_space<vmem>>, vector<1x1x64xf32>
    %3 = vector.shape_cast %2 : vector<1x1x64xf32> to vector<1x64xf32>
    %c0_i32 = arith.constant 0 : i32
    %4 = arith.cmpi sgt, %arg1, %c0_i32 : i32
    %cst = arith.constant 0.000000e+00 : f32
    %5 = vector.broadcast %cst : f32 to vector<1x64xf32>
    %6 = arith.select %4, %1, %5 : vector<1x64xf32>
    %c1_i32 = arith.constant 1 : i32
    %7 = arith.cmpi slt, %arg1, %c1_i32 : i32
    %cst_4 = arith.constant 0.000000e+00 : f32
    %8 = vector.broadcast %cst_4 : f32 to vector<1x64xf32>
    %9 = arith.select %7, %3, %8 : vector<1x64xf32>
    %c0_5 = arith.constant 0 : index
    %c0_6 = arith.constant 0 : index
    %c0_7 = arith.constant 0 : index
    %10 = vector.load %arg3[%c0_5, %c0_6, %c0_7] : memref<1x8x64xf32, #tpu.memory_space<vmem>>, vector<1x8x64xf32>
    %11 = vector.shape_cast %10 : vector<1x8x64xf32> to vector<8x64xf32>
    %12 = tpu.concatenate %6, %11, %9 in 0 : vector<1x64xf32>, vector<8x64xf32>, vector<1x64xf32> -> vector<10x64xf32>
    %13 = arith.truncf %12 : vector<10x64xf32> to vector<10x64xbf16>
    %cst_8 = arith.constant 0.000000e+00 : f32
    %14 = vector.broadcast %cst_8 : f32 to vector<8x128xf32>
    %15 = vector.extract_strided_slice %13 {offsets = [0, 0], sizes = [8, 64], strides = [1, 1]} : vector<10x64xbf16> to vector<8x64xbf16>
    %c0_9 = arith.constant 0 : index
    %c0_10 = arith.constant 0 : index
    %c0_11 = arith.constant 0 : index
    %16 = vector.load %arg7[%c0_9, %c0_10, %c0_11] : memref<3x64x128xbf16, #tpu.memory_space<vmem>>, vector<1x64x128xbf16>
    %17 = vector.shape_cast %16 : vector<1x64x128xbf16> to vector<64x128xbf16>
    %cst_12 = arith.constant dense<0.000000e+00> : vector<8x128xf32>
    %18 = tpu.matmul %15, %17, %cst_12 {dimension_numbers = #tpu.dot_dimension_numbers<[1], [0], [0], [1], [0, 0, 1, 1], [], []>} : vector<8x64xbf16>, vector<64x128xbf16>, vector<8x128xf32> -> vector<8x128xf32>
    %19 = arith.addf %14, %18 : vector<8x128xf32>
    %20 = vector.extract_strided_slice %13 {offsets = [1, 0], sizes = [8, 64], strides = [1, 1]} : vector<10x64xbf16> to vector<8x64xbf16>
    %c1 = arith.constant 1 : index
    %c0_13 = arith.constant 0 : index
    %c0_14 = arith.constant 0 : index
    %21 = vector.load %arg7[%c1, %c0_13, %c0_14] : memref<3x64x128xbf16, #tpu.memory_space<vmem>>, vector<1x64x128xbf16>
    %22 = vector.shape_cast %21 : vector<1x64x128xbf16> to vector<64x128xbf16>
    %cst_15 = arith.constant dense<0.000000e+00> : vector<8x128xf32>
    %23 = tpu.matmul %20, %22, %cst_15 {dimension_numbers = #tpu.dot_dimension_numbers<[1], [0], [0], [1], [0, 0, 1, 1], [], []>} : vector<8x64xbf16>, vector<64x128xbf16>, vector<8x128xf32> -> vector<8x128xf32>
    %24 = arith.addf %19, %23 : vector<8x128xf32>
    %25 = vector.extract_strided_slice %13 {offsets = [2, 0], sizes = [8, 64], strides = [1, 1]} : vector<10x64xbf16> to vector<8x64xbf16>
    %c2 = arith.constant 2 : index
    %c0_16 = arith.constant 0 : index
    %c0_17 = arith.constant 0 : index
    %26 = vector.load %arg7[%c2, %c0_16, %c0_17] : memref<3x64x128xbf16, #tpu.memory_space<vmem>>, vector<1x64x128xbf16>
    %27 = vector.shape_cast %26 : vector<1x64x128xbf16> to vector<64x128xbf16>
    %cst_18 = arith.constant dense<0.000000e+00> : vector<8x128xf32>
    %28 = tpu.matmul %25, %27, %cst_18 {dimension_numbers = #tpu.dot_dimension_numbers<[1], [0], [0], [1], [0, 0, 1, 1], [], []>} : vector<8x64xbf16>, vector<64x128xbf16>, vector<8x128xf32> -> vector<8x128xf32>
    %29 = arith.addf %24, %28 : vector<8x128xf32>
    %c4_i32 = arith.constant 4 : i32
    %30 = arith.muli %arg1, %c4_i32 : i32
    %c1_i32_19 = arith.constant 1 : i32
    %31 = arith.subi %30, %c1_i32_19 : i32
    %c0_i32_20 = arith.constant 0 : i32
    %32 = arith.maxsi %31, %c0_i32_20 : i32
    %c0_21 = arith.constant 0 : index
    %33 = arith.index_cast %32 : i32 to index
    %c0_22 = arith.constant 0 : index
    %34 = vector.load %arg2[%c0_21, %33, %c0_22] : memref<1x8x16xf32, #tpu.memory_space<vmem>>, vector<1x1x16xf32>
    %35 = vector.shape_cast %34 : vector<1x1x16xf32> to vector<1x16xf32>
    %c0_23 = arith.constant 0 : index
    %36 = arith.index_cast %30 : i32 to index
    %c0_24 = arith.constant 0 : index
    %37 = vector.load %arg2[%c0_23, %36, %c0_24] : memref<1x8x16xf32, #tpu.memory_space<vmem>>, vector<1x4x16xf32>
    %38 = vector.shape_cast %37 : vector<1x4x16xf32> to vector<4x16xf32>
    %c4_i32_25 = arith.constant 4 : i32
    %39 = arith.addi %30, %c4_i32_25 : i32
    %c7_i32 = arith.constant 7 : i32
    %40 = arith.minsi %39, %c7_i32 : i32
    %c0_26 = arith.constant 0 : index
    %41 = arith.index_cast %40 : i32 to index
    %c0_27 = arith.constant 0 : index
    %42 = vector.load %arg2[%c0_26, %41, %c0_27] : memref<1x8x16xf32, #tpu.memory_space<vmem>>, vector<1x1x16xf32>
    %43 = vector.shape_cast %42 : vector<1x1x16xf32> to vector<1x16xf32>
    %44 = tpu.concatenate %35, %38, %43 in 0 : vector<1x16xf32>, vector<4x16xf32>, vector<1x16xf32> -> vector<6x16xf32>
    %c0_28 = arith.constant 0 : index
    %c0_29 = arith.constant 0 : index
    %45 = vector.load %arg6[%c0_28, %c0_29] : memref<10x6xf32, #tpu.memory_space<vmem>>, vector<10x6xf32>
    %cst_30 = arith.constant dense<0.000000e+00> : vector<10x16xf32>
    %46 = tpu.matmul %45, %44, %cst_30 {dimension_numbers = #tpu.dot_dimension_numbers<[1], [0], [0], [1], [0, 0, 1, 1], [], []>} : vector<10x6xf32>, vector<6x16xf32>, vector<10x16xf32> -> vector<10x16xf32>
    %47 = tpu.iota {dimensions = array<i32: 0>} : vector<10x1xi32>
    %c0_i32_31 = arith.constant 0 : i32
    %48 = vector.broadcast %c0_i32_31 : i32 to vector<10x1xi32>
    %49 = arith.cmpi eq, %47, %48 : vector<10x1xi32>
    %c0_i32_32 = arith.constant 0 : i32
    %50 = arith.cmpi eq, %arg1, %c0_i32_32 : i32
    %51 = vector.broadcast %50 : i1 to vector<10x1xi1>
    %52 = arith.andi %49, %51 : vector<10x1xi1>
    %c9_i32 = arith.constant 9 : i32
    %53 = vector.broadcast %c9_i32 : i32 to vector<10x1xi32>
    %54 = arith.cmpi eq, %47, %53 : vector<10x1xi32>
    %c1_i32_33 = arith.constant 1 : i32
    %55 = arith.cmpi eq, %arg1, %c1_i32_33 : i32
    %56 = vector.broadcast %55 : i1 to vector<10x1xi1>
    %57 = arith.andi %54, %56 : vector<10x1xi1>
    %58 = arith.ori %52, %57 : vector<10x1xi1>
    %cst_34 = arith.constant 0.000000e+00 : f32
    %59 = vector.shape_cast %58 : vector<10x1xi1> to vector<10x1xi1>
    %60 = vector.broadcast %59 : vector<10x1xi1> to vector<10x16xi1>
    %61 = vector.broadcast %cst_34 : f32 to vector<10x16xf32>
    %62 = arith.select %60, %61, %46 : vector<10x16xi1>, vector<10x16xf32>
    %63 = arith.truncf %62 : vector<10x16xf32> to vector<10x16xbf16>
    %64 = vector.extract_strided_slice %63 {offsets = [0, 0], sizes = [8, 16], strides = [1, 1]} : vector<10x16xbf16> to vector<8x16xbf16>
    %c0_35 = arith.constant 0 : index
    %c0_36 = arith.constant 0 : index
    %c0_37 = arith.constant 0 : index
    %65 = vector.load %arg8[%c0_35, %c0_36, %c0_37] : memref<3x16x128xbf16, #tpu.memory_space<vmem>>, vector<1x16x128xbf16>
    %66 = vector.shape_cast %65 : vector<1x16x128xbf16> to vector<16x128xbf16>
    %cst_38 = arith.constant dense<0.000000e+00> : vector<8x128xf32>
    %67 = tpu.matmul %64, %66, %cst_38 {dimension_numbers = #tpu.dot_dimension_numbers<[1], [0], [0], [1], [0, 0, 1, 1], [], []>} : vector<8x16xbf16>, vector<16x128xbf16>, vector<8x128xf32> -> vector<8x128xf32>
    %68 = arith.addf %29, %67 : vector<8x128xf32>
    %69 = vector.extract_strided_slice %63 {offsets = [1, 0], sizes = [8, 16], strides = [1, 1]} : vector<10x16xbf16> to vector<8x16xbf16>
    %c1_39 = arith.constant 1 : index
    %c0_40 = arith.constant 0 : index
    %c0_41 = arith.constant 0 : index
    %70 = vector.load %arg8[%c1_39, %c0_40, %c0_41] : memref<3x16x128xbf16, #tpu.memory_space<vmem>>, vector<1x16x128xbf16>
    %71 = vector.shape_cast %70 : vector<1x16x128xbf16> to vector<16x128xbf16>
    %cst_42 = arith.constant dense<0.000000e+00> : vector<8x128xf32>
    %72 = tpu.matmul %69, %71, %cst_42 {dimension_numbers = #tpu.dot_dimension_numbers<[1], [0], [0], [1], [0, 0, 1, 1], [], []>} : vector<8x16xbf16>, vector<16x128xbf16>, vector<8x128xf32> -> vector<8x128xf32>
    %73 = arith.addf %68, %72 : vector<8x128xf32>
    %74 = vector.extract_strided_slice %63 {offsets = [2, 0], sizes = [8, 16], strides = [1, 1]} : vector<10x16xbf16> to vector<8x16xbf16>
    %c2_43 = arith.constant 2 : index
    %c0_44 = arith.constant 0 : index
    %c0_45 = arith.constant 0 : index
    %75 = vector.load %arg8[%c2_43, %c0_44, %c0_45] : memref<3x16x128xbf16, #tpu.memory_space<vmem>>, vector<1x16x128xbf16>
    %76 = vector.shape_cast %75 : vector<1x16x128xbf16> to vector<16x128xbf16>
    %cst_46 = arith.constant dense<0.000000e+00> : vector<8x128xf32>
    %77 = tpu.matmul %74, %76, %cst_46 {dimension_numbers = #tpu.dot_dimension_numbers<[1], [0], [0], [1], [0, 0, 1, 1], [], []>} : vector<8x16xbf16>, vector<16x128xbf16>, vector<8x128xf32> -> vector<8x128xf32>
    %78 = arith.addf %73, %77 : vector<8x128xf32>
    %c0_47 = arith.constant 0 : index
    %c0_48 = arith.constant 0 : index
    %79 = vector.load %arg9[%c0_47, %c0_48] : memref<1x128xf32, #tpu.memory_space<vmem>>, vector<1x128xf32>
    %80 = vector.broadcast %79 : vector<1x128xf32> to vector<8x128xf32>
    %81 = arith.mulf %78, %80 : vector<8x128xf32>
    %c0_49 = arith.constant 0 : index
    %c0_50 = arith.constant 0 : index
    %82 = vector.load %arg10[%c0_49, %c0_50] : memref<1x128xf32, #tpu.memory_space<vmem>>, vector<1x128xf32>
    %83 = vector.broadcast %82 : vector<1x128xf32> to vector<8x128xf32>
    %84 = arith.addf %81, %83 : vector<8x128xf32>
    %cst_51 = arith.constant 0.000000e+00 : f32
    %85 = vector.broadcast %cst_51 : f32 to vector<8x128xf32>
    %86 = arith.maximumf %84, %85 : vector<8x128xf32>
    %87 = vector.shape_cast %86 : vector<8x128xf32> to vector<1x8x128xf32>
    %c0_52 = arith.constant 0 : index
    %c0_53 = arith.constant 0 : index
    %c0_54 = arith.constant 0 : index
    %88 = vector.load %arg11[%c0_52, %c0_53, %c0_54] : memref<1x8x128xf32, #tpu.memory_space<vmem>>, vector<1x8x128xf32>
    tpu.vector_store %arg11[%c0_52, %c0_53, %c0_54], %87 {strides = array<i32>} : memref<1x8x128xf32, #tpu.memory_space<vmem>>, vector<1x8x128xf32>,
    return
  }
  func.func @transform_0(%arg0: i32, %arg1: i32) -> (i32, i32, i32) {
    %c0_i32 = arith.constant 0 : i32
    %c0_i32_0 = arith.constant 0 : i32
    %c0_i32_1 = arith.constant 0 : i32
    return %arg0, %c0_i32, %c0_i32_0 : i32, i32, i32
  }
  func.func @transform_1(%arg0: i32, %arg1: i32) -> (i32, i32, i32) {
    %c0_i32 = arith.constant 0 : i32
    %c0_i32_0 = arith.constant 0 : i32
    return %arg0, %arg1, %c0_i32 : i32, i32, i32
  }
  func.func @transform_2(%arg0: i32, %arg1: i32) -> (i32, i32, i32) {
    %c1_i32 = arith.constant 1 : i32
    %0 = arith.muli %arg1, %c1_i32 : i32
    %c1_i32_0 = arith.constant 1 : i32
    %1 = arith.subi %0, %c1_i32_0 : i32
    %c0_i32 = arith.constant 0 : i32
    %2 = arith.maxsi %1, %c0_i32 : i32
    %c0_i32_1 = arith.constant 0 : i32
    %c0_i32_2 = arith.constant 0 : i32
    return %arg0, %2, %c0_i32_1 : i32, i32, i32
  }
  func.func @transform_3(%arg0: i32, %arg1: i32) -> (i32, i32, i32) {
    %c1_i32 = arith.constant 1 : i32
    %0 = arith.muli %arg1, %c1_i32 : i32
    %c1_i32_0 = arith.constant 1 : i32
    %1 = arith.addi %0, %c1_i32_0 : i32
    %c1_i32_1 = arith.constant 1 : i32
    %2 = arith.minsi %1, %c1_i32_1 : i32
    %c0_i32 = arith.constant 0 : i32
    %c0_i32_2 = arith.constant 0 : i32
    return %arg0, %2, %c0_i32 : i32, i32, i32
  }
  func.func @transform_4(%arg0: i32, %arg1: i32) -> (i32, i32) {
    %c0_i32 = arith.constant 0 : i32
    %c0_i32_0 = arith.constant 0 : i32
    %c0_i32_1 = arith.constant 0 : i32
    return %c0_i32, %c0_i32_0 : i32, i32
  }
  func.func @transform_5(%arg0: i32, %arg1: i32) -> (i32, i32, i32) {
    %c0_i32 = arith.constant 0 : i32
    %c0_i32_0 = arith.constant 0 : i32
    %c0_i32_1 = arith.constant 0 : i32
    %c0_i32_2 = arith.constant 0 : i32
    return %c0_i32, %c0_i32_0, %c0_i32_1 : i32, i32, i32
  }
  func.func @transform_6(%arg0: i32, %arg1: i32) -> (i32, i32, i32) {
    %c0_i32 = arith.constant 0 : i32
    %c0_i32_0 = arith.constant 0 : i32
    %c0_i32_1 = arith.constant 0 : i32
    %c0_i32_2 = arith.constant 0 : i32
    return %c0_i32, %c0_i32_0, %c0_i32_1 : i32, i32, i32
  }
  func.func @transform_7(%arg0: i32, %arg1: i32) -> (i32, i32) {
    %c0_i32 = arith.constant 0 : i32
    %c0_i32_0 = arith.constant 0 : i32
    %c0_i32_1 = arith.constant 0 : i32
    return %c0_i32, %c0_i32_0 : i32, i32
  }
  func.func @transform_8(%arg0: i32, %arg1: i32) -> (i32, i32) {
    %c0_i32 = arith.constant 0 : i32
    %c0_i32_0 = arith.constant 0 : i32
    %c0_i32_1 = arith.constant 0 : i32
    return %c0_i32, %c0_i32_0 : i32, i32
  }
  func.func @transform_9(%arg0: i32, %arg1: i32) -> (i32, i32, i32) {
    %c0_i32 = arith.constant 0 : i32
    %c0_i32_0 = arith.constant 0 : i32
    return %arg0, %arg1, %c0_i32 : i32, i32, i32
  }
}

</mosaic_0001>

<bundles_post_ra>
// kernel: tile.18
= control target key start
LH: loop header
LB: loop body
LE: loop exit
PB: predicated region body
PF: predicated region fallthrough
CT: control target
= control target key end

     0   :  { %s28_s0 = inlined_call_operand.vmem [shape: f32[8], index: 0, kind: input, shape index: {}]   ;;  %s29_s1 = inlined_call_operand.vmem [shape: f32[16,8], index: 1, kind: output, shape index: {}]  }
   0x1   :  { %v4_v0 = vld [vmem:[%s28_s0] ss:$0 sm:$0xff] }
   0x2   :  { %5 = vst [vmem:[%s29_s1] sm:$0xff] %v4_v0  ;;  %8 = vst [vmem:[%s29_s1 + $0x8] sm:$0xff] %v4_v0 }

// kernel: tile.19
= control target key start
LH: loop header
LB: loop body
LE: loop exit
PB: predicated region body
PF: predicated region fallthrough
CT: control target
= control target key end

     0   :  { %s131_s10 = smov 120   ;;  %s132_s11 = smov 104   ;;  %vm3_vm0 = vcmask 64512   ;;  %vm9_vm1 = vcmask 1048512   ;;  %vm15_vm2 = vcmask 982912   ;;  %vm21_vm3 = vcmask 917312   ;;  %s207_s0 = inlined_call_operand.vmem [shape: f32[16,8], index: 0, kind: input, shape index: {}]   ;;  %s208_s1 = inlined_call_operand.vmem [shape: f32[1,128], index: 1, kind: output, shape index: {}]  }
   0x1   :  { %v101_v0 = vld [vmem:[%s207_s0 + $0xf] sm:$0x1]   ;;  %v103_v1 = vld [vmem:[%s207_s0 + $0xd] sm:$0x1]   ;;  %v102_v2 = vld [vmem:[%s207_s0 + $0xe] sm:$0x1]  }
   0x2   :  { %7 = vrot.lane.b32.xlu0 %v101_v0, %s131_s10  ;;  %19 = vrot.lane.b32.xlu1 %v103_v1, %s132_s11  ;;  %v104_v3 = vld [vmem:[%s207_s0 + $0xc] sm:$0x1]   ;;  %s133_s16 = smov 112   ;;  %s134_s17 = smov 96   ;;  %v105_v4 = vld [vmem:[%s207_s0 + $0xb] sm:$0x1]  }
   0x3   :  { %v106_v5 = vld [vmem:[%s207_s0 + $0xa] sm:$0x1]   ;;  %v2_v6 = vld [vmem:[%s207_s0] sm:$0x1]   ;;  %s135_s24 = smov 88   ;;  %s136_s25 = smov 80  }
   0x4   :  { %4 = vst.msk [vmem:[#allocation0] sm:$0x1] %vm3_vm0, %v2_v6   ;;  %v107_v7 = vld [vmem:[%s207_s0 + $0x9] sm:$0x1]   ;;  %v108_v8 = vld [vmem:[%s207_s0 + $0x8] sm:$0x1]  }
   0x5   :  { %s137_s30 = smov 72   ;;  %s138_s2 = smov 64   ;;  %v109_v9 = vld [vmem:[%s207_s0 + $0x7] sm:$0x1]   ;;  %v110_v10 = vld [vmem:[%s207_s0 + $0x6] sm:$0x1]  }
   0x6   :  { %13 = vrot.lane.b32.xlu0 %v102_v2, %s133_s16  ;;  %25 = vrot.lane.b32.xlu1 %v104_v3, %s134_s17  ;;  %s139_s7 = smov 56   ;;  %s140_s8 = smov 48   ;;  %v111_v11 = vld [vmem:[%s207_s0 + $0x5] sm:$0x1]   ;;  %v112_v12 = vld [vmem:[%s207_s0 + $0x4] sm:$0x1]  }
   0x7   :  { %s141_s13 = smov 40   ;;  %s142_s14 = smov 32   ;;  %v113_v13 = vld [vmem:[%s207_s0 + $0x3] sm:$0x1]   ;;  %v114_v14 = vld [vmem:[%s207_s0 + $0x2] sm:$0x1]  }
   0x8   :  { %s143_s19 = smov 24   ;;  %s144_s20 = smov 16   ;;  %v115_v15 = vld [vmem:[%s207_s0 + $0x1] sm:$0x1]   ;;  %vm27_vm4 = vcmask 851712   ;;  %vm33_vm5 = vcmask 786112  }
   0x9   :  { %s145_s0 = smov 8   ;;  %vm39_vm6 = vcmask 720512   ;;  %vm45_vm7 = vcmask 654912   ;;  %vm51_vm8 = vcmask 589312   ;;  %vm57_vm9 = vcmask 523712  }
   0xa   :  { %31 = vrot.lane.b32.xlu0 %v105_v4, %s135_s24  ;;  %37 = vrot.lane.b32.xlu1 %v106_v5, %s136_s25  ;;  %vm63_vm10 = vcmask 458112   ;;  %vm69_vm11 = vcmask 392512   ;;  %vm75_vm12 = vcmask 326912   ;;  %vm81_vm13 = vcmask 261312  }
   0xb   :  { %vm87_vm14 = vcmask 195712   ;;  %vm93_vm15 = vcmask 130112  }
   0xe   :  { %43 = vrot.lane.b32.xlu0 %v107_v7, %s137_s30  ;;  %49 = vrot.lane.b32.xlu1 %v108_v8, %s138_s2 }
  0x12   :  { %55 = vrot.lane.b32.xlu0 %v109_v9, %s139_s7  ;;  %61 = vrot.lane.b32.xlu1 %v110_v10, %s140_s8 }
  0x16   :  { %67 = vrot.lane.b32.xlu0 %v111_v11, %s141_s13  ;;  %73 = vrot.lane.b32.xlu1 %v112_v12, %s142_s14 }
  0x1a   :  { %79 = vrot.lane.b32.xlu0 %v113_v13, %s143_s19  ;;  %85 = vrot.lane.b32.xlu1 %v114_v14, %s144_s20 }
  0x1e   :  { %91 = vrot.lane.b32.xlu0 %v115_v15, %s145_s0 }
  0x74   :  { %v8_v16 = vpop.permute.xlu0 %7   ;;  %v20_v17 = vpop.permute.xlu1 %19  }
  0x75   :  { %10 = vst.msk [vmem:[#allocation0] sm:$0x1] %vm9_vm1, %v8_v16  }
  0x78   :  { %v14_v18 = vpop.permute.xlu0 %13   ;;  %v26_v19 = vpop.permute.xlu1 %25  }
  0x79   :  { %16 = vst.msk [vmem:[#allocation0] sm:$0x1] %vm15_vm2, %v14_v18  }
  0x7a   :  { %22 = vst.msk [vmem:[#allocation0] sm:$0x1] %vm21_vm3, %v20_v17  }
  0x7b   :  { %28 = vst.msk [vmem:[#allocation0] sm:$0x1] %vm27_vm4, %v26_v19  }
  0x7c   :  { %v32_v20 = vpop.permute.xlu0 %31   ;;  %v38_v21 = vpop.permute.xlu1 %37  }
  0x7d   :  { %34 = vst.msk [vmem:[#allocation0] sm:$0x1] %vm33_vm5, %v32_v20  }
  0x7e   :  { %40 = vst.msk [vmem:[#allocation0] sm:$0x1] %vm39_vm6, %v38_v21  }
  0x80   :  { %v44_v22 = vpop.permute.xlu0 %43   ;;  %v50_v23 = vpop.permute.xlu1 %49  }
  0x81   :  { %46 = vst.msk [vmem:[#allocation0] sm:$0x1] %vm45_vm7, %v44_v22  }
  0x82   :  { %52 = vst.msk [vmem:[#allocation0] sm:$0x1] %vm51_vm8, %v50_v23  }
  0x84   :  { %v56_v24 = vpop.permute.xlu0 %55   ;;  %v62_v25 = vpop.permute.xlu1 %61  }
  0x85   :  { %58 = vst.msk [vmem:[#allocation0] sm:$0x1] %vm57_vm9, %v56_v24  }
  0x86   :  { %64 = vst.msk [vmem:[#allocation0] sm:$0x1] %vm63_vm10, %v62_v25  }
  0x88   :  { %v68_v26 = vpop.permute.xlu0 %67   ;;  %v74_v27 = vpop.permute.xlu1 %73  }
  0x89   :  { %70 = vst.msk [vmem:[#allocation0] sm:$0x1] %vm69_vm11, %v68_v26  }
  0x8a   :  { %76 = vst.msk [vmem:[#allocation0] sm:$0x1] %vm75_vm12, %v74_v27  }
  0x8c   :  { %v80_v28 = vpop.permute.xlu0 %79   ;;  %v86_v29 = vpop.permute.xlu1 %85  }
  0x8d   :  { %82 = vst.msk [vmem:[#allocation0] sm:$0x1] %vm81_vm13, %v80_v28  }
  0x8e   :  { %88 = vst.msk [vmem:[#allocation0] sm:$0x1] %vm87_vm14, %v86_v29  }
  0x90   :  { %v92_v30 = vpop.permute.xlu0 %91  }
  0x91   :  { %94 = vst.msk [vmem:[#allocation0] sm:$0x1] %vm93_vm15, %v92_v30  }
  0x98   :  { %v98_v31 = vld [vmem:[#allocation0] sm:$0x1] }
  0x99   :  { %100 = vst [vmem:[%s208_s1] sm:$0x1] %v98_v31 }

// kernel: latent_conv_forward.1
= control target key start
LH: loop header
LB: loop body
LE: loop exit
PB: predicated region body
PF: predicated region fallthrough
CT: control target
= control target key end

     0   :  { %s1533_s30 = smov 0   ;;  %s1535_s10 = smov 0   ;;  %s1727_s0 = inlined_call_operand.vmem [shape: f32[2,8,16], index: 0, kind: input, shape index: {}]   ;;  %s1728_s1 = inlined_call_operand.vmem [shape: f32[2,16,64], index: 1, kind: input, shape index: {}, may-alias: {1,2,3}]   ;;  %s1729_s2 = inlined_call_operand.vmem [shape: f32[2,16,64], index: 2, kind: input, shape index: {}, may-alias: {1,2,3}]   ;;  %s1730_s3 = inlined_call_operand.vmem [shape: f32[2,16,64], index: 3, kind: input, shape index: {}, may-alias: {1,2,3}]   ;;  %s1731_s4 = inlined_call_operand.vmem [shape: f32[10,6], index: 4, kind: input, shape index: {}]   ;;  %s1732_s5 = inlined_call_operand.vmem [shape: bf16[3,64,128], index: 5, kind: input, shape index: {}]   ;;  %s1733_s6 = inlined_call_operand.vmem [shape: bf16[3,16,128], index: 6, kind: input, shape index: {}]   ;;  %s1734_s7 = inlined_call_operand.vmem [shape: f32[1,128], index: 7, kind: input, shape index: {}]   ;;  %s1735_s8 = inlined_call_operand.vmem [shape: f32[1,128], index: 8, kind: input, shape index: {}]   ;;  %s1736_s9 = inlined_call_operand.vmem [shape: f32[2,16,128], index: 9, kind: output, shape index: {}]  }
   0x1   :  { %s1537_s11 = smov 0   ;;  %s1539_s12 = smov 0  }
   0x2   :  { %s1541_s13 = smov 0  }
   0x3 LB: > { %s28_s14 = sadd.s32 1, %s1471_s11  ;;  %s31_s15 = sadd.s32 1, %s1475_s12  ;;  %s1479_s13 = sphi %s1541_s13, %s19_s13   ;;  %s1475_s12 = sphi %s1539_s12, %s1747_s12   ;;  %s1471_s11 = sphi %s1537_s11, %s1746_s11   ;;  %s1467_s10 = sphi %s1535_s10, %s1745_s10   ;;  %s1463_s30 = sphi %s1533_s30, %s1744_s30  }
   0x4   : > { %p29_p0 = scmp.ge.s32.totalorder %s28_s14, 2  ;;  %p1213_p1 = scmp.ge.s32.totalorder %s1479_s13, 1 }
   0x5   : > { %p369_p2 = scmp.lt.s32.totalorder %s1479_s13, 5 }
   0x6   : > { %s1749_s14 = smov (%p29_p0, %s28_s14), 0  ;;  %s1751_s15 = smov (!%p29_p0, %s31_s15), %s1475_s12 }
   0x7   : > { %1737 = sst [smem:[#allocation2_spill]] %s1749_s14  ;;  %p370_p3 = pnand %p1213_p1, %p369_p2 }
   0x8   : > { %p33_p4 = scmp.ge.s32.totalorder %s1751_s15, 2  ;;  %v1426_v0 = vld [vmem:[%s1732_s5 + $0x20] sm:$0xff] (!%p370_p3)   ;;  %v1481_v1 = vmov (!%p370_p3), 0.0   ;;  %v1427_v2 = vld [vmem:[%s1732_s5 + $0x28] sm:$0xff] (!%p370_p3)   ;;  %vm1482_vm0 = vmmov (!%p370_p3), 0   ;;  %p437_p5 = scmp.lt.s32.totalorder (!%p370_p3), %s1467_s10, 1  ;;  %v856_v41 = vlaneseq (!%p370_p3) }
   0x9   : > { %373 = sbr.rel (%p370_p3) target bundleno = 528 (0x210), region = 56  ;;  %1308 = vmatprep.subr.bf16.mxu1 (!%p370_p3), %v1481_v1  ;;  %1332 = vmatprep.subr.bf16.mxu0 (!%p370_p3), %v1481_v1  ;;  %p443_p6 = scmp.lt.s32.totalorder (!%p370_p3), %s1463_s30, 1  ;;  %v1428_v3 = vld [vmem:[%s1732_s5 + $0x30] sm:$0xff] (!%p370_p3)   ;;  %v1429_v4 = vld [vmem:[%s1732_s5 + $0x38] sm:$0xff] (!%p370_p3)   ;;  %v1434_v5 = vld [vmem:[%s1732_s5 + $0x40] sm:$0xff] (!%p370_p3)   ;;  %vm505_vm2 = vcmask (!%p370_p3), 1040384  }
   0xa   : > { %s1753_s15 = smov (%p33_p4, %s1751_s15), 0  ;;  %1309 = vmatpush3.bf16.msra.mxu1 (!%p370_p3), %v1426_v0  ;;  %1316 = vmatprep.mubr.msk.bf16.mxu1 (!%p370_p3), %vm1482_vm0, %v1481_v1  ;;  %s1217_s24 = sadd.s32 (!%p370_p3), 4294967295, %s1463_s30  ;;  %v1435_v6 = vld [vmem:[%s1732_s5 + $0x48] sm:$0xff] (!%p370_p3)   ;;  %v1436_v7 = vld [vmem:[%s1732_s5 + $0x50] sm:$0xff] (!%p370_p3)   ;;  %v1437_v12 = vld [vmem:[%s1732_s5 + $0x58] sm:$0xff] (!%p370_p3)   ;;  %vm557_vm4 = vcmask (!%p370_p3), 523264  }
   0xb   : > { %1738 = sst [smem:[#allocation3_spill]] %s1753_s15  ;;  %1310 = vmatprep.subr.bf16.mxu1 (!%p370_p3), %v1481_v1  ;;  %1340 = vmatprep.mubr.msk.bf16.mxu0 (!%p370_p3), %vm1482_vm0, %v1481_v1  ;;  %p450_p7 = scmp.gt.s32.totalorder (!%p370_p3), %s1217_s24, 0  ;;  %v1430_v25 = vld [vmem:[%s1732_s5] sm:$0xff] (!%p370_p3)   ;;  %v1431_v27 = vld [vmem:[%s1732_s5 + $0x8] sm:$0xff] (!%p370_p3)   ;;  %v1432_v31 = vld [vmem:[%s1732_s5 + $0x10] sm:$0xff] (!%p370_p3)   ;;  %vm766_vm5 = vcmask (!%p370_p3), 1044480  }
   0xc   : > { %p1218_p8 = scmp.lt.s32.totalorder (!%p370_p3), %s1217_s24, 1  ;;  %s463_s26 = sadd.s32 (!%p370_p3), 1, %s1463_s30  ;;  %1333 = vmatpush3.bf16.msra.mxu0 (!%p370_p3), %v1434_v5  ;;  %v1433_v35 = vld [vmem:[%s1732_s5 + $0x18] sm:$0xff] (!%p370_p3)   ;;  %vm777_vm6 = vcmask (!%p370_p3), 1045504   ;;  %v768_v37 = vld [vmem:[%s1731_s4] sm:$0xff] (!%p370_p3)  ;;  %vm770_vm7 = vcmask (!%p370_p3), 48128  }
   0xd   : > { %p1600_p9 = scmp.lt.s32.totalorder (!%p370_p3), %s463_s26, 1  ;;  %p488_p10 = scmp.gt.s32.totalorder (!%p370_p3), %s1463_s30, 0  ;;  %1334 = vmatprep.subr.bf16.mxu0 (!%p370_p3), %v1481_v1  ;;  %v769_v38 = vld [vmem:[%s1731_s4 + $0x8] sm:$0x3] (!%p370_p3)  ;;  %v1438_v40 = vld [vmem:[%s1733_s6] sm:$0xff] (!%p370_p3)   ;;  %v857_v42 = vshrl.u32 (!%p370_p3), %v856_v41, 7 }
   0xe   : > { %1311 = vmatpush3.bf16.msra.mxu1 (!%p370_p3), %v1427_v2  ;;  %p869_p13 = scmp.eq.s32.totalorder (!%p370_p3), %s1463_s30, 1  ;;  %p861_p0 = scmp.eq.s32.totalorder (!%p370_p3), %s1463_s30, 0  ;;  %vm892_vm14 = vcmask (!%p370_p3), 130048   ;;  %v1439_v54 = vld [vmem:[%s1733_s6 + $0x8] sm:$0xff] (!%p370_p3)   ;;  %v1440_v59 = vld [vmem:[%s1733_s6 + $0x10] sm:$0xff] (!%p370_p3)  }
   0xf   : > { %1312 = vmatprep.subr.bf16.mxu1 (!%p370_p3), %v1481_v1  ;;  %v858_v43 = vadd.s32 (!%p370_p3), 8, %v857_v42  ;;  %vm859_vm10 = vcmp.eq.s32.totalorder (!%p370_p3), %v857_v42, 0  ;;  %v1278_v63 = vld [vmem:[%s1734_s7] ss:$0 sm:$0xff] (!%p370_p3) }
  0x10   : > { %s1755_s10 = smov (!%p437_p5, %s1467_s10), 1  ;;  %s1757_s24 = smov (!%p450_p7, %s1217_s24), 0  ;;  %1335 = vmatpush3.bf16.msra.mxu0 %v1435_v6 }
  0x11   : > { %s444_s22 = scalar_select %p443_p6, %s1463_s30, 1  ;;  %1336 = vmatprep.subr.bf16.mxu0 %v1481_v1  ;;  %vm868_vm8 = vcmp.eq.s32.totalorder %v858_v43, 9 }
  0x12   : > { %s1588_s23 = sshll.u32 %s1755_s10, 1  ;;  %1313 = vmatpush3.bf16.msra.mxu1 %v1428_v3  ;;  %s1759_s24 = smov (!%p1218_p8, %s1757_s24), 1  ;;  %v1279_v3 = vld [vmem:[%s1735_s8] ss:$0 sm:$0xff] }
  0x13   : > { %s446_s25 = sadd.s32 %s1588_s23, %s444_s22  ;;  %1314 = vmatprep.subr.bf16.mxu1 %v1481_v1  ;;  %s1761_s26 = smov (!%p1600_p9, %s463_s26), 1 }
  0x14   : > { %s1598_s29 = sshll.u32 %s446_s25, 3  ;;  %s457_s21 = sadd.s32 %s1759_s24, %s1588_s23  ;;  %1337 = vmatpush3.bf16.msra.mxu0 %v1436_v7 }
  0x15   : > { %s1224_s22 = sshll.u32 %s457_s21, 3  ;;  %s448_s28 = scalar_lea.vmem %s1728_s1, %s1598_s29  ;;  %1338 = vmatprep.subr.bf16.mxu0 %v1481_v1 }
  0x16   : > { %1315 = vmatpush3.bf16.msra.mxu1 %v1429_v4  ;;  %s459_s15 = scalar_lea.vmem %s1729_s2, %s1224_s22  ;;  %s1763_s26 = smov (!%p1600_p9, %s1761_s26), 1  ;;  %v498_v9 = vld [vmem:[%s448_s28] sm:$0xff] }
  0x17   : > { %1320 = vmatprep.subr.bf16.mxu1 %v1481_v1  ;;  %s489_s20 = scalar_select %p488_p10, 1, 0  ;;  %v486_v10 = vld [vmem:[%s459_s15 + $0x7] sm:$0x1]  ;;  %v500_v14 = vrot.slane %v498_v9, 7 }
  0x18   : > { %s471_s21 = sadd.s32 %s1588_s23, %s1763_s26  ;;  %1339 = vmatpush3.bf16.msra.mxu0 %v1437_v12  ;;  %s1214_s15 = sshll.u32 %s1755_s10, 3 }
  0x19   : > { %s1229_s14 = sshll.u32 %s471_s21, 3  ;;  %v490_v8 = vstv %s489_s20  ;;  %1349 = vmatprep.subr.bf16.mxu0 %v1481_v1  ;;  %s440_s24 = scalar_lea.vmem %s1727_s0, %s1214_s15 }
  0x1a   : > { %s473_s17 = scalar_lea.vmem %s1730_s3, %s1229_s14  ;;  %vm1633_vm1 = vcmp.eq.s32.totalorder %v490_v8, 1  ;;  %s1263_s14 = sshll.u32 %s1463_s30, 2 }
  0x1b   : > { %s494_s23 = scalar_select %p443_p6, 1, 0  ;;  %v487_v13 = vld [vmem:[%s473_s17] sm:$0x1]  ;;  %v492_v15 = vsel %vm1633_vm1, %v486_v10, 0.0 }
  0x1c   : > { %v506_v19 = vsel %vm505_vm2, %v492_v15, %v500_v14  ;;  %s754_s26 = sadd.s32 4, %s1263_s14  ;;  %s1264_s28 = sadd.s32 4294967295, %s1263_s14 }
  0x1d   : > { %v495_v16 = vstv %s494_s23  ;;  %p755_p11 = scmp.lt.s32.totalorder %s754_s26, 7  ;;  %p748_p12 = scmp.gt.s32.totalorder %s1264_s28, 0 }
  0x1e   : > { %vm496_vm3 = vcmp.eq.s32.totalorder %v495_v16, 1  ;;  %s752_s20 = scalar_lea.vmem %s440_s24, %s1263_s14 }
  0x1f   : > { %v497_v17 = vsel %vm496_vm3, %v487_v13, 0.0  ;;  %s1765_s26 = smov (!%p755_p11, %s754_s26), 7  ;;  %s1767_s28 = smov (!%p748_p12, %s1264_s28), 0  ;;  %v753_v28 = vld [vmem:[%s752_s20] sm:$0xf] }
  0x20   : > { %v503_v18 = vrot.slane %v497_v17, 7  ;;  %s757_s17 = scalar_lea.vmem %s440_s24, %s1765_s26  ;;  %s750_s16 = scalar_lea.vmem %s440_s24, %s1767_s28  ;;  %v760_v30 = vrot.slane %v753_v28, 7 }
  0x21   : > { %v758_v29 = vld [vmem:[%s757_s17] sm:$0x1]  ;;  %s870_s21 = scalar_select %p869_p13, 1, 0 }
  0x22   : > { %v507_v20 = vsel %vm505_vm2, %v500_v14, %v503_v18  ;;  %v751_v32 = vld [vmem:[%s750_s16] sm:$0x1]  ;;  %v763_v33 = vrot.slane %v758_v29, 3  ;;  %s862_s25 = scalar_select %p861_p0, 1, 0 }
  0x23   : > { %v508_v21 = vpack.c.bf16 %v507_v20, %v506_v19  ;;  %v765_v34 = vsel %vm505_vm2, %v751_v32, %v760_v30  ;;  %v871_v45 = vstv %s870_s21  ;;  %s484_s28 = scalar_lea.vmem %s1736_s9, %s1598_s29 }
  0x24   : > { %v767_v36 = vsel %vm766_vm5, %v765_v34, %v763_v33  ;;  %v863_v47 = vstv %s862_s25  ;;  %vm872_vm9 = vcmp.eq.s32.totalorder %v871_v45, 1 }
  0x25   : > { %v527_v22 = vshrl.u32 %v508_v21, 16  ;;  %v529_v23 = vshll.u32 %v508_v21, 16  ;;  %v677_v39 = vrot.slane %v508_v21, 1  ;;  %vm864_vm11 = vcmp.eq.s32.totalorder %v863_v47, 1  ;;  %vm874_vm12 = vmand %vm868_vm8, %vm872_vm9 }
  0x26   : > { %vm865_vm13 = vmand %vm859_vm10, %vm864_vm11 }
  0x27   : > { %v531_v24 = vrot.slane %v529_v23, 1  ;;  %1341 = vmatmul.mubr.msk.bf16.vlgmr.msra.gmra.mrb[0].mxu0 %vm557_vm4, %v677_v39 }
  0x28   : > { %1351 = vmatprep.mubr.msk.bf16.mxu0 %vm1482_vm0, %v1481_v1  ;;  %1350 = vmatpush3.bf16.msra.mxu0 %v1438_v40 }
  0x29   : > { %v532_v26 = vor.u32 %v531_v24, %v527_v22  ;;  %1355 = vmatprep.subr.bf16.mxu0 %v1481_v1 }
  0x2b   : > { %1317 = vmatmul.mubr.msk.bf16.vlgmr.msra.gmra.mrb[0].mxu1 %vm557_vm4, %v532_v26 }
  0x2c   : > { %1321 = vmatpush3.bf16.msra.mxu1 %v1430_v25  ;;  %1328 = vmatprep.mubr.msk.bf16.mxu1 %vm1482_vm0, %v1481_v1 }
  0x2d   : > { %1322 = vmatprep.subr.bf16.mxu1 %v1481_v1 }
  0x30   : > { %1323 = vmatpush3.bf16.msra.mxu1 %v1431_v27 }
  0x31   : > { %1324 = vmatprep.subr.bf16.mxu1 %v1481_v1 }
  0x34   : > { %1325 = vmatpush3.bf16.msra.mxu1 %v1432_v31 }
  0x35   : > { %1326 = vmatprep.subr.bf16.mxu1 %v1481_v1 }
  0x38   : > { %1327 = vmatpush3.bf16.msra.mxu1 %v1433_v35 }
  0x39   : > { %1344 = vmatprep.subr.msk.mxu1 %vm777_vm6, %v767_v36 }
  0x3b   : > { %1329 = vmatmul.mubr.msk.bf16.vlgmr.msra.gmra.mrb[0].mxu1 %vm557_vm4, %v508_v21 }
  0x3c   : > { %1345 = vmatpush3.msk.msra.mxu1 %vm777_vm6, %v767_v36  ;;  %1346 = vmatprep.mubr.msk.f32.mxu1 %vm770_vm7, %v768_v37 }
  0x43   : > { %1347 = vmatmul.mubr.msk.f32.vlgmr.msra.gmra.mrb[4].mxu1 %vm770_vm7, %v769_v38 }
 0x10e   : > { %v661_v44 = vpop.f32.mrb[0].mxu1 }
 0x10f   : > { %v1330_v46 = vpop.f32.mrb[1].mxu1 }
 0x110   : > { %v664_v48 = vpop.f32.mrb[2].mxu1 }
 0x111   : > { %v1331_v49 = vpop.f32.mrb[3].mxu1 }
 0x116   : > { %v1348_v50 = vpop.f32.mrb[4].mxu1 }
 0x117   : > { %v882_v51 = vsel %vm874_vm12, 0.0, %v1348_v50  ;;  %v847_v52 = vpop.f32.mrb[5].mxu1 }
 0x118   : > { %v881_v53 = vsel %vm865_vm13, 0.0, %v847_v52 }
 0x119   : > { %v883_v55 = vpack.c.bf16 %v882_v51, %v881_v53 }
 0x11b   : > { %1352 = vmatmul.mubr.msk.bf16.vlgmr.msra.gmra.mrb[0].mxu0 %vm892_vm14, %v883_v55  ;;  %v942_v56 = vshll.u32 %v883_v55, 16  ;;  %v940_v58 = vshrl.u32 %v883_v55, 16  ;;  %v1000_v61 = vrot.slane %v883_v55, 1 }
 0x11c   : > { %1356 = vmatpush3.bf16.msra.mxu0 %v1439_v54  ;;  %1357 = vmatprep.mubr.msk.bf16.mxu0 %vm1482_vm0, %v1481_v1 }
 0x11d   : > { %1361 = vmatprep.subr.bf16.mxu0 %v1481_v1  ;;  %v944_v57 = vrot.slane %v942_v56, 1 }
 0x11f   : > { %v945_v60 = vor.u32 %v944_v57, %v940_v58 }
 0x127   : > { %1358 = vmatmul.mubr.msk.bf16.vlgmr.msra.gmra.mrb[0].mxu0 %vm892_vm14, %v945_v60 }
 0x128   : > { %1362 = vmatpush3.bf16.msra.mxu0 %v1440_v59  ;;  %1363 = vmatprep.mubr.msk.bf16.mxu0 %vm1482_vm0, %v1481_v1 }
 0x133   : > { %1364 = vmatmul.mubr.msk.bf16.vlgmr.msra.gmra.mrb[0].mxu0 %vm892_vm14, %v1000_v61 }
 0x206   : > { %v1044_v62 = vpop.f32.mrb[0].mxu0 }
 0x207   : > { %v1367_v0 = vadd.f32 %v1044_v62, %v661_v44  ;;  %v1365_v2 = vpop.f32.mrb[1].mxu0 }
 0x208   : > { %v1047_v4 = vpop.f32.mrb[2].mxu0 }
 0x209   : > { %v1058_v5 = vmul.f32 %v1367_v0, %v1278_v63  ;;  %v1366_v6 = vpop.f32.mrb[3].mxu0 }
 0x20b   : > { %v1066_v7 = vadd.f32 %v1279_v3, %v1058_v5 }
 0x20d   : > { %v1067_v1 = vmax.f32 %v1066_v7, 0.0 }
 0x20f   : > { %1068 = vst [vmem:[%s484_s28] sm:$0xff] %v1067_v1 }
 0x210 PF: > { %s19_s13 = sadd.s32 1, %s1479_s13   ;;  %s1742_s18 = sld [smem:[#allocation2_spill]] }
 0x211   : > { %p16_p1 = scmp.ge.s32.totalorder %s19_s13, 6   ;;  %s1743_s19 = sld [smem:[#allocation3_spill]] }
 0x212   : > { %s1744_s30 = smov %s1471_s11  ;;  %s1745_s10 = smov %s1475_s12 }
 0x213   :  { %18 = sbr.rel (!%p16_p1) target bundleno = 3 (0x3), region = 102 }
 0x216   : > { %s1746_s11 = smov %s1742_s18 }
 0x217   : > { %s1747_s12 = smov %s1743_s19 }

</bundles_post_ra>
